<compile_context>
chip_gen: v6e
topology: v6e:2x2x1
jax: 0.10.0
libtpu: 0.0.40
codegen_flags: <defaults>
</compile_context>

<pallas_src>
import jax
import jax.numpy as jnp
from jax import lax
from jax.experimental import pallas as pl
from jax.experimental.pallas import tpu as pltpu

# ---- module hyper-parameters (small, consistent with the PyTorch module) ----
MAX_CHILDS        = 8
NUM_EDGES         = 8
NODE_FEAT_SIZE_IN = 10    # feature_size of BoxEncoder1
NODE_FEAT_SIZE    = 32    # node_feat_size (output of second_object)
HIDDEN_SIZE       = 32
EDGE_TYPE_NUM     = 4
NUM_ITERATIONS    = 2
# node_symmetric_type is unused in forward(); MoveableEncoder / child_op /
# parent_op / skip_op_object are constructed but never called in forward().

# ---- packed-weight row layout (all blocks start on a 16-row bf16 sublane tile) ----
_W1_R0   = 0                        # rows [  0,  10)  : w1  (Fin, H)
_W2_R0   = 16                       # rows [ 16,  48)  : w2  (H, H)
_WNE0_R0 = 48                       # rows [ 48, 116)  : wne[0] (2H+E, H)
_WNE1_R0 = 128                      # rows [128, 196)  : wne[1] (2H+E, H)
_WSO_R0  = 208                      # rows [208, 304)  : wso (3H, F)
_W_ROWS  = 304


def _leaky(v, slope=0.1):
    return jnp.where(v >= 0, v, slope * v)


def gnn_encoder_kernel(x_ref,        # (C, Fin)   f32   node features
                       w_ref,        # (304, 32)  bf16  packed weights
                       b_ref,        # (5, 32)    f32   packed biases [b1,b2,bne0,bne1,bso]
                       idx_col_ref,  # (2*Ne, 1)  i32   [from ; to] edge endpoints
                       from_row_ref, # (1, Ne)    i32   edge source indices (scatter target)
                       efeat_ref,    # (Ne, E)    f32   edge_type_onehot
                       out_ref,      # (C, F)     f32
                       ne_in_ref,    # scratch: (Ne, 2H+E) f32  fused node_edge input
                       pf_ref):      # scratch: (C, 3H)    f32  [h0 | h1 | h2]
    f32 = jnp.float32
    bf  = jnp.bfloat16
    C, Ne, H, E = MAX_CHILDS, NUM_EDGES, HIDDEN_SIZE, EDGE_TYPE_NUM

    b = b_ref[...]                                        # (5, H) f32

    # --- BoxEncoder1: leaky(leaky(W1 x + b1)) then leaky(W2 . + b2) ---
    x = x_ref[...].astype(bf)                             # (C, Fin)
    h = jnp.dot(x, w_ref[_W1_R0:_W1_R0 + NODE_FEAT_SIZE_IN, :],
                preferred_element_type=f32) + b[0:1, :]
    h = _leaky(h, 0.01)                                   # fused double LeakyReLU(0.1)
    h = jnp.dot(h.astype(bf), w_ref[_W2_R0:_W2_R0 + H, :],
                preferred_element_type=f32) + b[1:2, :]
    h = _leaky(h, 0.1)

    # --- build gather / scatter one-hot masks on the VPU (no host one_hot, no DMA) ---
    idx_col = idx_col_ref[...]                            # (2Ne, 1) int32
    gath = (lax.broadcasted_iota(jnp.int32, (2 * Ne, C), 1) == idx_col)
    gath = gath.astype(f32).astype(bf)                    # (2Ne, C) exact 0/1
    from_row = from_row_ref[...]                          # (1, Ne) int32
    scat = (lax.broadcasted_iota(jnp.int32, (C, Ne), 0) == from_row)
    scat = scat.astype(f32).astype(bf)                    # (C, Ne) exact 0/1

    # edge features occupy the tail lanes of the fused node_edge input; constant across
    # iterations, so write once.
    ne_in_ref[:, 2 * H:2 * H + E] = efeat_ref[...]

    # second_object is applied once at the end on [h0 | h1 | h2]
    pf_ref[:, 0:H] = h

    wne_row0 = (_WNE0_R0, _WNE1_R0)
    for i in range(NUM_ITERATIONS):
        # gather both edge endpoints with a single (2Ne, C) @ (C, H) MXU op
        g = jnp.dot(gath, h.astype(bf), preferred_element_type=f32)   # (2Ne, H)
        ne_in_ref[:, 0:H]     = g[0:Ne, :]
        ne_in_ref[:, H:2 * H] = g[Ne:2 * Ne, :]
        # fused node_edge_op[i]: single (Ne, 2H+E) @ (2H+E, H) dot + bias + relu
        r0 = wne_row0[i]
        ne = jnp.dot(ne_in_ref[...].astype(bf), w_ref[r0:r0 + 2 * H + E, :],
                     preferred_element_type=f32) + b[2 + i:3 + i, :]
        ne = jnp.maximum(ne, 0.0)
        # scatter_add over edge-source indices (edge_symmetric_type == 'sum')
        h = jnp.dot(scat, ne.astype(bf), preferred_element_type=f32)  # (C, H)
        pf_ref[:, (i + 1) * H:(i + 2) * H] = h

    # second_object + leaky_relu(0.1): one (C, 3H) @ (3H, F) dot
    out = jnp.dot(pf_ref[...].astype(bf), w_ref[_WSO_R0:_WSO_R0 + (NUM_ITERATIONS + 1) * H, :],
                  preferred_element_type=f32) + b[4:5, :]
    out_ref[...] = _leaky(out, 0.1)


def init_params(key):
    """Deterministic synthetic weights (shapes from GNNEncoder.__init__)."""
    ks = jax.random.split(key, 8)
    s = 0.1
    H, Fin, F, E, I = HIDDEN_SIZE, NODE_FEAT_SIZE_IN, NODE_FEAT_SIZE, EDGE_TYPE_NUM, NUM_ITERATIONS
    return {
        # BoxEncoder1
        "w1": s * jax.random.normal(ks[0], (Fin, H), jnp.float32),
        "b1": s * jax.random.normal(ks[1], (1, H), jnp.float32),
        "w2": s * jax.random.normal(ks[2], (H, H), jnp.float32),
        "b2": s * jax.random.normal(ks[3], (1, H), jnp.float32),
        # node_edge_op[i] : Linear(2H + E, H)
        "wne": s * jax.random.normal(ks[4], (I, 2 * H + E, H), jnp.float32),
        "bne": s * jax.random.normal(ks[5], (I, 1, H), jnp.float32),
        # second_object : Linear(H * (I+1), F)
        "wso": s * jax.random.normal(ks[6], (H * (I + 1), F), jnp.float32),
        "bso": s * jax.random.normal(ks[7], (1, F), jnp.float32),
    }


def pack_params(params):
    """One-time packing (hoisted out of the per-call path): weights -> one bf16 buffer
    (all row blocks 16-row aligned), biases -> one f32 buffer."""
    H, E, I = HIDDEN_SIZE, EDGE_TYPE_NUM, NUM_ITERATIONS
    w = jnp.zeros((_W_ROWS, H), jnp.float32)
    w = w.at[_W1_R0:_W1_R0 + NODE_FEAT_SIZE_IN].set(params["w1"])
    w = w.at[_W2_R0:_W2_R0 + H].set(params["w2"])
    w = w.at[_WNE0_R0:_WNE0_R0 + 2 * H + E].set(params["wne"][0])
    w = w.at[_WNE1_R0:_WNE1_R0 + 2 * H + E].set(params["wne"][1])
    w = w.at[_WSO_R0:_WSO_R0 + (I + 1) * H].set(params["wso"])
    b = jnp.concatenate([params["b1"], params["b2"],
                         params["bne"][0], params["bne"][1], params["bso"]], axis=0)
    return {"w": w.astype(jnp.bfloat16), "b": b.astype(jnp.float32)}


@jax.jit
def gnn_encoder_forward(packed, child_feats, edge_indices, edge_type_onehot):
    """child_feats: (1, C, Fin), edge_indices: (1, Ne, 2) int32, edge_type_onehot: (1, Ne, E)."""
    if child_feats.shape[0] != 1:
        raise ValueError("Currently only a single batch is supported.")
    C, Ne, H, E, I = MAX_CHILDS, NUM_EDGES, HIDDEN_SIZE, EDGE_TYPE_NUM, NUM_ITERATIONS

    x = child_feats[0].astype(jnp.float32)                         # (C, Fin)
    ei = edge_indices[0].astype(jnp.int32)                         # (Ne, 2)
    idx_col = jnp.concatenate([ei[:, 0], ei[:, 1]])[:, None]       # (2Ne, 1)  [from ; to]
    from_row = ei[:, 0][None, :]                                   # (1, Ne)
    efeat = edge_type_onehot[0].astype(jnp.float32)                # (Ne, E)
    # TODO(synk): padded / non-existent edges must be masked upstream (same as PyTorch module).

    vmem = pl.BlockSpec(memory_space=pltpu.MemorySpace.VMEM)
    out = pl.pallas_call(
        gnn_encoder_kernel,
        out_shape=jax.ShapeDtypeStruct((C, NODE_FEAT_SIZE), jnp.float32),
        in_specs=[vmem] * 6,
        out_specs=vmem,
        scratch_shapes=[pltpu.VMEM((Ne, 2 * H + E), jnp.float32),      # fused node_edge input
                        pltpu.VMEM((C, (I + 1) * H), jnp.float32)],    # [h0 | h1 | h2]
    )(x, packed["w"], packed["b"], idx_col, from_row, efeat)
    return out                                                     # (C, node_feat_size)


def reference_forward(params, child_feats, edge_indices, edge_type_onehot):
    """Pure-JAX mirror of the PyTorch forward (for correctness check), f32 HIGHEST precision."""
    hi = lax.Precision.HIGHEST
    x = child_feats[0].astype(jnp.float32)
    ei = edge_indices[0]
    ef = edge_type_onehot[0].astype(jnp.float32)
    h = _leaky(_leaky(jnp.dot(x, params["w1"], precision=hi) + params["b1"]))
    h = _leaky(jnp.dot(h, params["w2"], precision=hi) + params["b2"])
    iter_feats = [h]
    for i in range(NUM_ITERATIONS):
        ne = jnp.concatenate([h[ei[:, 0]], h[ei[:, 1]], ef], axis=1)
        ne = jnp.maximum(jnp.dot(ne, params["wne"][i], precision=hi) + params["bne"][i], 0.0)
        h = jax.ops.segment_sum(ne, ei[:, 0], num_segments=MAX_CHILDS)  # scatter_add ('sum')
        iter_feats.append(h)
    parent = jnp.concatenate(iter_feats, axis=1)
    return _leaky(jnp.dot(parent, params["wso"], precision=hi) + params["bso"])


if __name__ == "__main__":
    key = jax.random.PRNGKey(0)
    kp, kx, ke, kt = jax.random.split(key, 4)

    params = init_params(kp)
    packed = pack_params(params)     # one-time packing, outside the per-call path

    child_feats = jax.random.normal(kx, (1, MAX_CHILDS, NODE_FEAT_SIZE_IN), jnp.float32)
    edge_indices = jax.random.randint(ke, (1, NUM_EDGES, 2), 0, MAX_CHILDS, jnp.int32)
    edge_types = jax.random.randint(kt, (1, NUM_EDGES), 0, EDGE_TYPE_NUM, jnp.int32)
    edge_type_onehot = jax.nn.one_hot(edge_types, EDGE_TYPE_NUM, dtype=jnp.float32)

    out = gnn_encoder_forward(packed, child_feats, edge_indices, edge_type_onehot)
    out = jax.block_until_ready(out)

    ref = reference_forward(params, child_feats, edge_indices, edge_type_onehot)
    err = float(jnp.max(jnp.abs(out - ref)))
    assert out.shape == (MAX_CHILDS, NODE_FEAT_SIZE), out.shape
    # Kernel feeds the MXU bf16 operands (f32 accumulation) per the perf review, so the
    # tolerance vs the f32 HIGHEST-precision reference is a bit looser than pure-f32.
    assert err < 5e-2, f"mismatch vs reference: max abs err {err}"

    print("KERNEL_OK")
</pallas_src>

<mosaic_0001>
module attributes {stable_mosaic.version = 11 : i64} {
  func.func @gnn_encoder_kernel(%arg0: memref<8x10xf32, #tpu.memory_space<vmem>>, %arg1: memref<304x32xbf16, #tpu.memory_space<vmem>>, %arg2: memref<5x32xf32, #tpu.memory_space<vmem>>, %arg3: memref<16x1xi32, #tpu.memory_space<vmem>>, %arg4: memref<1x8xi32, #tpu.memory_space<vmem>>, %arg5: memref<8x4xf32, #tpu.memory_space<vmem>>, %arg6: memref<8x32xf32, #tpu.memory_space<vmem>>, %arg7: memref<8x68xf32, #tpu.memory_space<vmem>>, %arg8: memref<8x96xf32, #tpu.memory_space<vmem>>) attributes {dimension_semantics = [], scalar_prefetch = 0 : i64, scratch_operands = 2 : i64, tpu.core_type = #tpu.core_type<tc>} {
    %c0 = arith.constant 0 : index
    %c0_0 = arith.constant 0 : index
    %0 = vector.load %arg2[%c0, %c0_0] : memref<5x32xf32, #tpu.memory_space<vmem>>, vector<5x32xf32>
    %c0_1 = arith.constant 0 : index
    %c0_2 = arith.constant 0 : index
    %1 = vector.load %arg0[%c0_1, %c0_2] : memref<8x10xf32, #tpu.memory_space<vmem>>, vector<8x10xf32>
    %2 = arith.truncf %1 : vector<8x10xf32> to vector<8x10xbf16>
    %c0_3 = arith.constant 0 : index
    %c0_4 = arith.constant 0 : index
    %3 = vector.load %arg1[%c0_3, %c0_4] : memref<304x32xbf16, #tpu.memory_space<vmem>>, vector<10x32xbf16>
    %cst = arith.constant dense<0.000000e+00> : vector<8x32xf32>
    %4 = tpu.matmul %2, %3, %cst {dimension_numbers = #tpu.dot_dimension_numbers<[1], [0], [0], [1], [0, 0, 1, 1], [], []>} : vector<8x10xbf16>, vector<10x32xbf16>, vector<8x32xf32> -> vector<8x32xf32>
    %5 = vector.extract_strided_slice %0 {offsets = [0, 0], sizes = [1, 32], strides = [1, 1]} : vector<5x32xf32> to vector<1x32xf32>
    %6 = vector.broadcast %5 : vector<1x32xf32> to vector<8x32xf32>
    %7 = arith.addf %4, %6 : vector<8x32xf32>
    %cst_5 = arith.constant 0.000000e+00 : f32
    %8 = vector.broadcast %cst_5 : f32 to vector<8x32xf32>
    %9 = arith.cmpf oge, %7, %8 : vector<8x32xf32>
    %cst_6 = arith.constant 0.00999999977 : f32
    %10 = vector.broadcast %cst_6 : f32 to vector<8x32xf32>
    %11 = arith.mulf %10, %7 : vector<8x32xf32>
    %12 = arith.select %9, %7, %11 : vector<8x32xi1>, vector<8x32xf32>
    %13 = arith.truncf %12 : vector<8x32xf32> to vector<8x32xbf16>
    %c16 = arith.constant 16 : index
    %c0_7 = arith.constant 0 : index
    %14 = vector.load %arg1[%c16, %c0_7] : memref<304x32xbf16, #tpu.memory_space<vmem>>, vector<32x32xbf16>
    %cst_8 = arith.constant dense<0.000000e+00> : vector<8x32xf32>
    %15 = tpu.matmul %13, %14, %cst_8 {dimension_numbers = #tpu.dot_dimension_numbers<[1], [0], [0], [1], [0, 0, 1, 1], [], []>} : vector<8x32xbf16>, vector<32x32xbf16>, vector<8x32xf32> -> vector<8x32xf32>
    %16 = vector.extract_strided_slice %0 {offsets = [1, 0], sizes = [1, 32], strides = [1, 1]} : vector<5x32xf32> to vector<1x32xf32>
    %17 = vector.broadcast %16 : vector<1x32xf32> to vector<8x32xf32>
    %18 = arith.addf %15, %17 : vector<8x32xf32>
    %cst_9 = arith.constant 0.000000e+00 : f32
    %19 = vector.broadcast %cst_9 : f32 to vector<8x32xf32>
    %20 = arith.cmpf oge, %18, %19 : vector<8x32xf32>
    %cst_10 = arith.constant 1.000000e-01 : f32
    %21 = vector.broadcast %cst_10 : f32 to vector<8x32xf32>
    %22 = arith.mulf %21, %18 : vector<8x32xf32>
    %23 = arith.select %20, %18, %22 : vector<8x32xi1>, vector<8x32xf32>
    %c0_11 = arith.constant 0 : index
    %c0_12 = arith.constant 0 : index
    %24 = vector.load %arg3[%c0_11, %c0_12] : memref<16x1xi32, #tpu.memory_space<vmem>>, vector<16x1xi32>
    %25 = tpu.iota {dimensions = array<i32: 1>} : vector<16x8xi32>
    %26 = vector.broadcast %24 : vector<16x1xi32> to vector<16x8xi32>
    %27 = arith.cmpi eq, %25, %26 : vector<16x8xi32>
    %28 = arith.extui %27 : vector<16x8xi1> to vector<16x8xi32>
    %29 = arith.sitofp %28 : vector<16x8xi32> to vector<16x8xf32>
    %30 = arith.truncf %29 : vector<16x8xf32> to vector<16x8xbf16>
    %c0_13 = arith.constant 0 : index
    %c0_14 = arith.constant 0 : index
    %31 = vector.load %arg4[%c0_13, %c0_14] : memref<1x8xi32, #tpu.memory_space<vmem>>, vector<1x8xi32>
    %32 = tpu.iota {dimensions = array<i32: 0>} : vector<8x8xi32>
    %33 = vector.broadcast %31 : vector<1x8xi32> to vector<8x8xi32>
    %34 = arith.cmpi eq, %32, %33 : vector<8x8xi32>
    %35 = arith.extui %34 : vector<8x8xi1> to vector<8x8xi32>
    %36 = arith.sitofp %35 : vector<8x8xi32> to vector<8x8xf32>
    %37 = arith.truncf %36 : vector<8x8xf32> to vector<8x8xbf16>
    %c0_15 = arith.constant 0 : index
    %c0_16 = arith.constant 0 : index
    %38 = vector.load %arg5[%c0_15, %c0_16] : memref<8x4xf32, #tpu.memory_space<vmem>>, vector<8x4xf32>
    %c0_17 = arith.constant 0 : index
    %c64 = arith.constant 64 : index
    %39 = vector.load %arg7[%c0_17, %c64] : memref<8x68xf32, #tpu.memory_space<vmem>>, vector<8x4xf32>
    tpu.vector_store %arg7[%c0_17, %c64], %38 {strides = array<i32>} : memref<8x68xf32, #tpu.memory_space<vmem>>, vector<8x4xf32>,
    %c0_18 = arith.constant 0 : index
    %c0_19 = arith.constant 0 : index
    %40 = vector.load %arg8[%c0_18, %c0_19] : memref<8x96xf32, #tpu.memory_space<vmem>>, vector<8x32xf32>
    tpu.vector_store %arg8[%c0_18, %c0_19], %23 {strides = array<i32>} : memref<8x96xf32, #tpu.memory_space<vmem>>, vector<8x32xf32>,
    %41 = arith.truncf %23 : vector<8x32xf32> to vector<8x32xbf16>
    %cst_20 = arith.constant dense<0.000000e+00> : vector<16x32xf32>
    %42 = tpu.matmul %30, %41, %cst_20 {dimension_numbers = #tpu.dot_dimension_numbers<[1], [0], [0], [1], [0, 0, 1, 1], [], []>} : vector<16x8xbf16>, vector<8x32xbf16>, vector<16x32xf32> -> vector<16x32xf32>
    %43 = vector.extract_strided_slice %42 {offsets = [0, 0], sizes = [8, 32], strides = [1, 1]} : vector<16x32xf32> to vector<8x32xf32>
    %c0_21 = arith.constant 0 : index
    %c0_22 = arith.constant 0 : index
    %44 = vector.load %arg7[%c0_21, %c0_22] : memref<8x68xf32, #tpu.memory_space<vmem>>, vector<8x32xf32>
    tpu.vector_store %arg7[%c0_21, %c0_22], %43 {strides = array<i32>} : memref<8x68xf32, #tpu.memory_space<vmem>>, vector<8x32xf32>,
    %45 = vector.extract_strided_slice %42 {offsets = [8, 0], sizes = [8, 32], strides = [1, 1]} : vector<16x32xf32> to vector<8x32xf32>
    %c0_23 = arith.constant 0 : index
    %c32 = arith.constant 32 : index
    %46 = vector.load %arg7[%c0_23, %c32] : memref<8x68xf32, #tpu.memory_space<vmem>>, vector<8x32xf32>
    tpu.vector_store %arg7[%c0_23, %c32], %45 {strides = array<i32>} : memref<8x68xf32, #tpu.memory_space<vmem>>, vector<8x32xf32>,
    %c0_24 = arith.constant 0 : index
    %c0_25 = arith.constant 0 : index
    %47 = vector.load %arg7[%c0_24, %c0_25] : memref<8x68xf32, #tpu.memory_space<vmem>>, vector<8x68xf32>
    %48 = arith.truncf %47 : vector<8x68xf32> to vector<8x68xbf16>
    %c48 = arith.constant 48 : index
    %c0_26 = arith.constant 0 : index
    %49 = vector.load %arg1[%c48, %c0_26] : memref<304x32xbf16, #tpu.memory_space<vmem>>, vector<68x32xbf16>
    %cst_27 = arith.constant dense<0.000000e+00> : vector<8x32xf32>
    %50 = tpu.matmul %48, %49, %cst_27 {dimension_numbers = #tpu.dot_dimension_numbers<[1], [0], [0], [1], [0, 0, 1, 1], [], []>} : vector<8x68xbf16>, vector<68x32xbf16>, vector<8x32xf32> -> vector<8x32xf32>
    %51 = vector.extract_strided_slice %0 {offsets = [2, 0], sizes = [1, 32], strides = [1, 1]} : vector<5x32xf32> to vector<1x32xf32>
    %52 = vector.broadcast %51 : vector<1x32xf32> to vector<8x32xf32>
    %53 = arith.addf %50, %52 : vector<8x32xf32>
    %cst_28 = arith.constant 0.000000e+00 : f32
    %54 = vector.broadcast %cst_28 : f32 to vector<8x32xf32>
    %55 = arith.maximumf %53, %54 : vector<8x32xf32>
    %56 = arith.truncf %55 : vector<8x32xf32> to vector<8x32xbf16>
    %cst_29 = arith.constant dense<0.000000e+00> : vector<8x32xf32>
    %57 = tpu.matmul %37, %56, %cst_29 {dimension_numbers = #tpu.dot_dimension_numbers<[1], [0], [0], [1], [0, 0, 1, 1], [], []>} : vector<8x8xbf16>, vector<8x32xbf16>, vector<8x32xf32> -> vector<8x32xf32>
    %c0_30 = arith.constant 0 : index
    %c32_31 = arith.constant 32 : index
    %58 = vector.load %arg8[%c0_30, %c32_31] : memref<8x96xf32, #tpu.memory_space<vmem>>, vector<8x32xf32>
    tpu.vector_store %arg8[%c0_30, %c32_31], %57 {strides = array<i32>} : memref<8x96xf32, #tpu.memory_space<vmem>>, vector<8x32xf32>,
    %59 = arith.truncf %57 : vector<8x32xf32> to vector<8x32xbf16>
    %cst_32 = arith.constant dense<0.000000e+00> : vector<16x32xf32>
    %60 = tpu.matmul %30, %59, %cst_32 {dimension_numbers = #tpu.dot_dimension_numbers<[1], [0], [0], [1], [0, 0, 1, 1], [], []>} : vector<16x8xbf16>, vector<8x32xbf16>, vector<16x32xf32> -> vector<16x32xf32>
    %61 = vector.extract_strided_slice %60 {offsets = [0, 0], sizes = [8, 32], strides = [1, 1]} : vector<16x32xf32> to vector<8x32xf32>
    %c0_33 = arith.constant 0 : index
    %c0_34 = arith.constant 0 : index
    %62 = vector.load %arg7[%c0_33, %c0_34] : memref<8x68xf32, #tpu.memory_space<vmem>>, vector<8x32xf32>
    tpu.vector_store %arg7[%c0_33, %c0_34], %61 {strides = array<i32>} : memref<8x68xf32, #tpu.memory_space<vmem>>, vector<8x32xf32>,
    %63 = vector.extract_strided_slice %60 {offsets = [8, 0], sizes = [8, 32], strides = [1, 1]} : vector<16x32xf32> to vector<8x32xf32>
    %c0_35 = arith.constant 0 : index
    %c32_36 = arith.constant 32 : index
    %64 = vector.load %arg7[%c0_35, %c32_36] : memref<8x68xf32, #tpu.memory_space<vmem>>, vector<8x32xf32>
    tpu.vector_store %arg7[%c0_35, %c32_36], %63 {strides = array<i32>} : memref<8x68xf32, #tpu.memory_space<vmem>>, vector<8x32xf32>,
    %c0_37 = arith.constant 0 : index
    %c0_38 = arith.constant 0 : index
    %65 = vector.load %arg7[%c0_37, %c0_38] : memref<8x68xf32, #tpu.memory_space<vmem>>, vector<8x68xf32>
    %66 = arith.truncf %65 : vector<8x68xf32> to vector<8x68xbf16>
    %c128 = arith.constant 128 : index
    %c0_39 = arith.constant 0 : index
    %67 = vector.load %arg1[%c128, %c0_39] : memref<304x32xbf16, #tpu.memory_space<vmem>>, vector<68x32xbf16>
    %cst_40 = arith.constant dense<0.000000e+00> : vector<8x32xf32>
    %68 = tpu.matmul %66, %67, %cst_40 {dimension_numbers = #tpu.dot_dimension_numbers<[1], [0], [0], [1], [0, 0, 1, 1], [], []>} : vector<8x68xbf16>, vector<68x32xbf16>, vector<8x32xf32> -> vector<8x32xf32>
    %69 = vector.extract_strided_slice %0 {offsets = [3, 0], sizes = [1, 32], strides = [1, 1]} : vector<5x32xf32> to vector<1x32xf32>
    %70 = vector.broadcast %69 : vector<1x32xf32> to vector<8x32xf32>
    %71 = arith.addf %68, %70 : vector<8x32xf32>
    %cst_41 = arith.constant 0.000000e+00 : f32
    %72 = vector.broadcast %cst_41 : f32 to vector<8x32xf32>
    %73 = arith.maximumf %71, %72 : vector<8x32xf32>
    %74 = arith.truncf %73 : vector<8x32xf32> to vector<8x32xbf16>
    %cst_42 = arith.constant dense<0.000000e+00> : vector<8x32xf32>
    %75 = tpu.matmul %37, %74, %cst_42 {dimension_numbers = #tpu.dot_dimension_numbers<[1], [0], [0], [1], [0, 0, 1, 1], [], []>} : vector<8x8xbf16>, vector<8x32xbf16>, vector<8x32xf32> -> vector<8x32xf32>
    %c0_43 = arith.constant 0 : index
    %c64_44 = arith.constant 64 : index
    %76 = vector.load %arg8[%c0_43, %c64_44] : memref<8x96xf32, #tpu.memory_space<vmem>>, vector<8x32xf32>
    tpu.vector_store %arg8[%c0_43, %c64_44], %75 {strides = array<i32>} : memref<8x96xf32, #tpu.memory_space<vmem>>, vector<8x32xf32>,
    %c0_45 = arith.constant 0 : index
    %c0_46 = arith.constant 0 : index
    %77 = vector.load %arg8[%c0_45, %c0_46] : memref<8x96xf32, #tpu.memory_space<vmem>>, vector<8x96xf32>
    %78 = arith.truncf %77 : vector<8x96xf32> to vector<8x96xbf16>
    %c208 = arith.constant 208 : index
    %c0_47 = arith.constant 0 : index
    %79 = vector.load %arg1[%c208, %c0_47] : memref<304x32xbf16, #tpu.memory_space<vmem>>, vector<96x32xbf16>
    %cst_48 = arith.constant dense<0.000000e+00> : vector<8x32xf32>
    %80 = tpu.matmul %78, %79, %cst_48 {dimension_numbers = #tpu.dot_dimension_numbers<[1], [0], [0], [1], [0, 0, 1, 1], [], []>} : vector<8x96xbf16>, vector<96x32xbf16>, vector<8x32xf32> -> vector<8x32xf32>
    %81 = vector.extract_strided_slice %0 {offsets = [4, 0], sizes = [1, 32], strides = [1, 1]} : vector<5x32xf32> to vector<1x32xf32>
    %82 = vector.broadcast %81 : vector<1x32xf32> to vector<8x32xf32>
    %83 = arith.addf %80, %82 : vector<8x32xf32>
    %cst_49 = arith.constant 0.000000e+00 : f32
    %84 = vector.broadcast %cst_49 : f32 to vector<8x32xf32>
    %85 = arith.cmpf oge, %83, %84 : vector<8x32xf32>
    %cst_50 = arith.constant 1.000000e-01 : f32
    %86 = vector.broadcast %cst_50 : f32 to vector<8x32xf32>
    %87 = arith.mulf %86, %83 : vector<8x32xf32>
    %88 = arith.select %85, %83, %87 : vector<8x32xi1>, vector<8x32xf32>
    %c0_51 = arith.constant 0 : index
    %c0_52 = arith.constant 0 : index
    %89 = vector.load %arg6[%c0_51, %c0_52] : memref<8x32xf32, #tpu.memory_space<vmem>>, vector<8x32xf32>
    tpu.vector_store %arg6[%c0_51, %c0_52], %88 {strides = array<i32>} : memref<8x32xf32, #tpu.memory_space<vmem>>, vector<8x32xf32>,
    return
  }
}

</mosaic_0001>

<bundles_post_ra>
// kernel: gnn_encoder_forward.1
= control target key start
LH: loop header
LB: loop body
LE: loop exit
PB: predicated region body
PF: predicated region fallthrough
CT: control target
= control target key end

     0   :  { %vm43_vm0 = vcmask 1044480   ;;  %v894_v0 = vmov 0.0   ;;  %vm895_vm1 = vmmov 0   ;;  %vm39_vm2 = vcmask 80896   ;;  %s1101_s0 = inlined_call_operand.vmem [shape: f32[8,10], index: 0, kind: input, shape index: {}]   ;;  %s1102_s1 = inlined_call_operand.vmem [shape: bf16[304,32], index: 1, kind: input, shape index: {}]   ;;  %s1103_s2 = inlined_call_operand.vmem [shape: f32[5,32], index: 2, kind: input, shape index: {}]   ;;  %s1104_s3 = inlined_call_operand.vmem [shape: s32[16,1], index: 3, kind: input, shape index: {}]   ;;  %s1105_s4 = inlined_call_operand.vmem [shape: s32[1,8], index: 4, kind: input, shape index: {}]   ;;  %s1106_s5 = inlined_call_operand.vmem [shape: f32[8,4], index: 5, kind: input, shape index: {}]   ;;  %s1107_s6 = inlined_call_operand.hbm [shape: f32[8,32], index: 6, kind: output, shape index: {}]  }
   0x1   :  { %764 = vmatprep.subr.bf16.mxu0 %v894_v0  ;;  %v853_v1 = vld [vmem:[%s1102_s1] sm:$0x1f]   ;;  %784 = vmatprep.subr.bf16.mxu1 %v894_v0 }
   0x2   :  { %v26_v2 = vld [vmem:[%s1101_s0] sm:$0xff]  ;;  %766 = vmatprep.mubr.msk.bf16.mxu0 %vm895_vm1, %v894_v0  ;;  %794 = vmatprep.mubr.msk.bf16.mxu1 %vm895_vm1, %v894_v0  ;;  %v45_v3 = vsel %vm43_vm0, %v853_v1, 0 }
   0x3   :  { %v27_v4 = vpack.c.bf16 %v26_v2, %v26_v2  ;;  %765 = vmatpush3.bf16.msra.mxu0 %v45_v3 }
   0x4   :  { %770 = vmatprep.subr.bf16.mxu0 %v894_v0 }
   0x6   :  { %767 = vmatmul.mubr.msk.bf16.vlgmr.msra.gmra.mxu0 %vm39_vm2, %v27_v4 }
   0x7   :  { %774 = vmatprep.mubr.msk.bf16.mxu0 %vm895_vm1, %v894_v0 }
   0x8   :  { %11 = vsyncpa [#allocation5], 0  ;;  %v854_v5 = vld [vmem:[%s1102_s1 + $0x10] sm:$0xff]   ;;  %v855_v6 = vld [vmem:[%s1102_s1 + $0x8] sm:$0xff]   ;;  %v896_v8 = vmov 0   ;;  %v30_v10 = vlaneseq  ;;  %vm111_vm4 = vcmask 261120  }
   0x9   :  { %771 = vmatpush3.bf16.msra.mxu0 %v854_v5  ;;  %v158_v7 = vld [vmem:[%s1104_s3] sm:$0xff]  ;;  %852 = vset.pattern.permute.xlu0 %v896_v8  ;;  %v159_v9 = vld [vmem:[%s1104_s3 + $0x8] sm:$0xff]  ;;  %s897_s10 = smov 64   ;;  %vm191_vm5 = vcmask 556544   ;;  %vm199_vm9 = vcmask 1043456   ;;  %vm195_vm10 = vcmask 64512  }
   0xa   :  { %772 = vmatprep.subr.bf16.mxu0 %v894_v0  ;;  %163 = vperm.xlu0 %852, %v158_v7   ;;  %v964_v11 = vshrl.u32 %v30_v10, 7  ;;  %v970_v13 = vld [vmem:[%s1103_s2] sm:$0x1f]  ;;  %v161_v28 = vand.u32 127, %v30_v10  ;;  %vm297_vm11 = vcmask 1041408   ;;  %v858_v44 = vld [vmem:[%s1102_s1 + $0x30] sm:$0xff]  }
   0xb   :  { %v186_v23 = vld [vmem:[%s1106_s5] sm:$0xff]  ;;  %v856_v42 = vld [vmem:[%s1102_s1 + $0x38] ss:$0 sps:$4 sm:$0x33]   ;;  %v859_v45 = vld [vmem:[%s1102_s1 + $0x28] sm:$0xff]   ;;  %s898_s20 = smov 32  }
   0xc   :  { %v32_v12 = vsub.s32 0, %v964_v11  ;;  %188 = vrot.lane.b32.xlu1 %v186_v23, %s897_s10  ;;  %v97_v24 = vsub.s32 1, %v964_v11  ;;  %v299_v43 = vsel %vm297_vm11, %v856_v42, 0  ;;  %v860_v46 = vld [vmem:[%s1102_s1 + $0x20] sm:$0xff]   ;;  %v861_v47 = vld [vmem:[%s1102_s1 + $0x18] sm:$0xff]   ;;  %vm249_vm12 = vcmask 523520  }
   0xd   :  { %773 = vmatpush3.bf16.msra.mxu0 %v855_v6  ;;  %785 = vmatpush3.bf16.msra.mxu1 %v299_v43  ;;  %vm293_vm13 = vcmask 556032   ;;  %v264_v55 = vsub.s32 2, %v964_v11  ;;  %v707_v57 = vld [vmem:[%s1105_s4] ss:$0 sm:$0xff]  ;;  %v871_v42 = vld [vmem:[%s1102_s1 + $0x68] sm:$0xff]   ;;  %vm582_vm15 = vcmask 785920  }
   0xe   :  { %778 = vmatprep.subr.bf16.mxu0 %v894_v0  ;;  %166 = vperm.xlu0 %852, %v159_v9   ;;  %v33_v14 = vrot.slane %v970_v13, %v32_v12  ;;  %v98_v26 = vrot.slane %v970_v13, %v97_v24  ;;  %vm182_vm14 = vcmp.eq.s32.totalorder %v964_v11, %v707_v57  ;;  %v857_v6 = vld [vmem:[%s1102_s1 + $0x60] ss:$0 sps:$4 sm:$0x33]   ;;  %vm638_vm0 = vcmask 785408  }
   0xf   :  { %786 = vmatprep.subr.bf16.mxu1 %v894_v0  ;;  %v265_v56 = vrot.slane %v970_v13, %v264_v55  ;;  %v708_v63 = vsel %vm182_vm14, 1.0, %v894_v0  ;;  %v491_v12 = vsel %vm297_vm11, %v857_v6, 0 }
  0x10   :  { %v185_v4 = vpack.c.bf16 %v708_v63, %v708_v63 }
  0x11   :  { %787 = vmatpush3.bf16.msra.mxu1 %v858_v44 }
  0x12   :  { %788 = vmatprep.subr.bf16.mxu1 %v894_v0 }
  0x15   :  { %789 = vmatpush3.bf16.msra.mxu1 %v859_v45 }
  0x16   :  { %790 = vmatprep.subr.bf16.mxu1 %v894_v0 }
  0x19   :  { %791 = vmatpush3.bf16.msra.mxu1 %v860_v46 }
  0x1a   :  { %792 = vmatprep.subr.bf16.mxu1 %v894_v0 }
  0x1d   :  { %793 = vmatpush3.bf16.msra.mxu1 %v861_v47 }
  0x1e   :  { %824 = vmatprep.subr.bf16.mxu1 %v894_v0 }
  0x7e   :  { %v189_v27 = vpop.permute.xlu1 %188 }
  0x7f   :  { %192 = vst.msk [vmem:[#allocation2] sm:$0xff] %vm191_vm5, %v189_v27  ;;  %v458_v27 = vsub.s32 3, %v964_v11 }
  0x85   :  { %v164_v25 = vpop.permute.xlu0 %163 }
  0x86   :  { %vm168_vm7 = vcmp.eq.s32.totalorder %v161_v28, %v164_v25 }
  0x87   :  { %v705_v38 = vsel %vm168_vm7, 1.0, %v894_v0 }
  0x89   :  { %v167_v31 = vpop.permute.xlu0 %166 }
  0x8a   :  { %vm169_vm8 = vcmp.eq.s32.totalorder %v161_v28, %v167_v31  ;;  %v459_v28 = vrot.slane %v970_v13, %v458_v27 }
  0x8b   :  { %v706_v39 = vsel %vm169_vm8, 1.0, %v894_v0 }
  0x8c   :  { %v986_v41 = vpack.c.bf16 %v706_v39, %v705_v38  ;;  %v867_v38 = vld [vmem:[%s1102_s1 + $0x88] sm:$0xff]   ;;  %v868_v39 = vld [vmem:[%s1102_s1 + $0x80] sm:$0xff]  }
  0xc6   :  { %v81_v15 = vpop.f32.mrf.mxu0 }
  0xc7   :  { %v82_v16 = vadd.f32 %v81_v15, %v33_v14  ;;  %v862_v15 = vld [vmem:[%s1102_s1 + $0x58] sm:$0xff]  }
  0xc8   :  { %v768_v17 = vpop.f32.mrf.mxu0 }
  0xc9   :  { %vm87_vm3 = vcmp.ge.f32.partialorder %v82_v16, 0.0  ;;  %v88_v18 = vmul.f32 0.01, %v82_v16 }
  0xca   :  { %v84_v19 = vpop.f32.mrf.mxu0 }
  0xcb   :  { %v89_v20 = vsel %vm87_vm3, %v82_v16, %v88_v18  ;;  %v863_v16 = vld [vmem:[%s1102_s1 + $0x50] sm:$0xff]   ;;  %v864_v18 = vld [vmem:[%s1102_s1 + $0x48] sm:$0xff]   ;;  %v865_v19 = vld [vmem:[%s1102_s1 + $0x40] sm:$0xff]  }
  0xcc   :  { %v90_v21 = vpack.c.bf16 %v89_v20, %v89_v20  ;;  %v769_v22 = vpop.f32.mrf.mxu0 }
  0xce   :  { %775 = vmatmul.mubr.msk.bf16.vlgmr.msra.gmra.mxu0 %vm111_vm4, %v90_v21 }
  0xcf   :  { %780 = vmatprep.mubr.msk.bf16.mxu0 %vm895_vm1, %v894_v0 }
 0x18e   :  { %v149_v29 = vpop.f32.mrf.mxu0 }
 0x18f   :  { %v150_v30 = vadd.f32 %v149_v29, %v98_v26 }
 0x190   :  { %v776_v32 = vpop.f32.mrf.mxu0 }
 0x191   :  { %vm155_vm6 = vcmp.ge.f32.partialorder %v150_v30, 0.0  ;;  %v156_v33 = vmul.f32 0.1, %v150_v30 }
 0x192   :  { %v152_v34 = vpop.f32.mrf.mxu0 }
 0x193   :  { %v157_v35 = vsel %vm155_vm6, %v150_v30, %v156_v33 }
 0x194   :  { %193 = vst.msk [vmem:[#allocation3] sm:$0xff] %vm111_vm4, %v157_v35  ;;  %v777_v36 = vpop.f32.mrf.mxu0  ;;  %v194_v37 = vpack.c.bf16 %v157_v35, %v157_v35 }
 0x196   :  { %v201_v40 = vsel %vm199_vm9, %v194_v37, 0  ;;  %v866_v37 = vld [vmem:[%s1102_s1 + $0x90] sm:$0xff]  }
 0x197   :  { %779 = vmatpush3.bf16.msra.mxu0 %v201_v40  ;;  %v869_v40 = vld [vmem:[%s1102_s1 + $0x78] sm:$0xff]  }
 0x198   :  { %798 = vmatprep.subr.bf16.mxu0 %v894_v0 }
 0x19a   :  { %781 = vmatmul.mubr.msk.bf16.vlgmr.msra.gmra.mxu0 %vm195_vm10, %v986_v41 }
 0x19b   :  { %800 = vmatprep.mubr.msk.bf16.mxu0 %vm895_vm1, %v894_v0 }
 0x25a   :  { %v237_v48 = vpop.f32.mrf.mxu0 }
 0x25b   :  { %244 = vst.msk [vmem:[#allocation2] sm:$0xff] %vm111_vm4, %v237_v48 }
 0x25c   :  { %v782_v49 = vpop.f32.mrf.mxu0 }
 0x25e   :  { %v240_v50 = vpop.f32.mrf.mxu0 }
 0x25f   :  { %246 = vrot.lane.b32.xlu1 %v240_v50, %s898_s20  ;;  %v600_v50 = vsub.s32 4, %v964_v11 }
 0x260   :  { %v783_v51 = vpop.f32.mrf.mxu0 }
 0x261   :  { %v601_v51 = vrot.slane %v970_v13, %v600_v50 }
 0x2d1   :  { %v247_v52 = vpop.permute.xlu1 %246 }
 0x2d2   :  { %250 = vst.msk [vmem:[#allocation2] sm:$0xff] %vm249_vm12, %v247_v52 }
 0x2d9   :  { %v251_v53 = vld [vmem:[#allocation2] sm:$0xff] }
 0x2da   :  { %v252_v54 = vpack.c.bf16 %v251_v53, %v251_v53 }
 0x2dc   :  { %795 = vmatmul.mubr.msk.bf16.vlgmr.msra.gmra.mxu1 %vm293_vm13, %v252_v54 }
 0x2dd   :  { %826 = vmatprep.mubr.msk.bf16.mxu1 %vm895_vm1, %v894_v0 }
 0x39c   :  { %v335_v58 = vpop.f32.mrf.mxu1 }
 0x39d   :  { %v336_v59 = vadd.f32 %v335_v58, %v265_v56 }
 0x39e   :  { %v796_v60 = vpop.f32.mrf.mxu1 }
 0x39f   :  { %v341_v61 = vmax.f32 %v336_v59, 0.0 }
 0x3a0   :  { %v338_v62 = vpop.f32.mrf.mxu1 }
 0x3a1   :  { %v342_v1 = vpack.c.bf16 %v341_v61, %v341_v61 }
 0x3a2   :  { %v797_v2 = vpop.f32.mrf.mxu1 }
 0x3a3   :  { %v347_v3 = vsel %vm199_vm9, %v342_v1, 0 }
 0x3a4   :  { %799 = vmatpush3.bf16.msra.mxu0 %v347_v3 }
 0x3a5   :  { %804 = vmatprep.subr.bf16.mxu0 %v894_v0 }
 0x3a7   :  { %801 = vmatmul.mubr.msk.bf16.vlgmr.msra.gmra.mxu0 %vm195_vm10, %v185_v4 }
 0x3a8   :  { %806 = vmatprep.mubr.msk.bf16.mxu0 %vm895_vm1, %v894_v0 }
 0x467   :  { %v383_v5 = vpop.f32.mrf.mxu0 }
 0x468   :  { %v394_v7 = vpack.c.bf16 %v383_v5, %v383_v5  ;;  %390 = vrot.lane.b32.xlu1 %v383_v5, %s898_s20 }
 0x469   :  { %v802_v8 = vpop.f32.mrf.mxu0 }
 0x46a   :  { %v396_v9 = vsel %vm199_vm9, %v394_v7, 0 }
 0x46b   :  { %v386_v10 = vpop.f32.mrf.mxu0  ;;  %805 = vmatpush3.bf16.msra.mxu0 %v396_v9 }
 0x46c   :  { %810 = vmatprep.subr.bf16.mxu0 %v894_v0 }
 0x46d   :  { %v803_v14 = vpop.f32.mrf.mxu0 }
 0x46e   :  { %807 = vmatmul.mubr.msk.bf16.vlgmr.msra.gmra.mxu0 %vm195_vm10, %v986_v41  ;;  %v870_v41 = vld [vmem:[%s1102_s1 + $0x70] sm:$0xff]   ;;  %s899_s1 = smov [#allocation4]  }
 0x46f   :  { %811 = vmatpush3.bf16.msra.mxu0 %v491_v12  ;;  %820 = vmatprep.mubr.msk.bf16.mxu0 %vm895_vm1, %v894_v0  ;;  %s692_s17 = sshll.u32 %s899_s1, 4  ;;  %s693_s17 = int_to_ptr.vmem [resolvable:$true] %s692_s17 }
 0x470   :  { %812 = vmatprep.subr.bf16.mxu0 %v894_v0  ;;  %p877_p1 = scmp.lt.s32.totalorder %s693_s17, %s693_s17 }
 0x473   :  { %813 = vmatpush3.bf16.msra.mxu0 %v862_v15 }
 0x474   :  { %814 = vmatprep.subr.bf16.mxu0 %v894_v0 }
 0x477   :  { %815 = vmatpush3.bf16.msra.mxu0 %v863_v16 }
 0x478   :  { %816 = vmatprep.subr.bf16.mxu0 %v894_v0 }
 0x47b   :  { %817 = vmatpush3.bf16.msra.mxu0 %v864_v18 }
 0x47c   :  { %818 = vmatprep.subr.bf16.mxu0 %v894_v0 }
 0x47f   :  { %819 = vmatpush3.bf16.msra.mxu0 %v865_v19 }
 0x4da   :  { %v391_v17 = vpop.permute.xlu1 %390 }
 0x4db   :  { %393 = vst.msk [vmem:[#allocation3] sm:$0xff] %vm249_vm12, %v391_v17 }
 0x52e   :  { %v432_v20 = vpop.f32.mrf.mxu0 }
 0x52f   :  { %439 = vst.msk [vmem:[#allocation2] sm:$0xff] %vm111_vm4, %v432_v20 }
 0x530   :  { %v808_v21 = vpop.f32.mrf.mxu0 }
 0x532   :  { %v435_v22 = vpop.f32.mrf.mxu0 }
 0x533   :  { %441 = vrot.lane.b32.xlu0 %v435_v22, %s898_s20 }
 0x534   :  { %v809_v23 = vpop.f32.mrf.mxu0 }
 0x5a5   :  { %v442_v24 = vpop.permute.xlu0 %441 }
 0x5a6   :  { %444 = vst.msk [vmem:[#allocation2] sm:$0xff] %vm249_vm12, %v442_v24 }
 0x5ad   :  { %v445_v25 = vld [vmem:[#allocation2] sm:$0xff] }
 0x5ae   :  { %v446_v26 = vpack.c.bf16 %v445_v25, %v445_v25 }
 0x5b0   :  { %821 = vmatmul.mubr.msk.bf16.vlgmr.msra.gmra.mxu0 %vm293_vm13, %v446_v26 }
 0x670   :  { %v527_v29 = vpop.f32.mrf.mxu0 }
 0x671   :  { %v528_v30 = vadd.f32 %v527_v29, %v459_v28 }
 0x672   :  { %v822_v31 = vpop.f32.mrf.mxu0 }
 0x673   :  { %v533_v32 = vmax.f32 %v528_v30, 0.0 }
 0x674   :  { %v530_v33 = vpop.f32.mrf.mxu0 }
 0x675   :  { %v534_v34 = vpack.c.bf16 %v533_v32, %v533_v32 }
 0x676   :  { %v823_v35 = vpop.f32.mrf.mxu0 }
 0x677   :  { %v536_v36 = vsel %vm199_vm9, %v534_v34, 0 }
 0x678   :  { %825 = vmatpush3.bf16.msra.mxu1 %v536_v36 }
 0x679   :  { %830 = vmatprep.subr.bf16.mxu1 %v894_v0 }
 0x67b   :  { %827 = vmatmul.mubr.msk.bf16.vlgmr.msra.gmra.mxu1 %vm195_vm10, %v185_v4 }
 0x67c   :  { %842 = vmatprep.mubr.msk.bf16.mxu1 %vm895_vm1, %v894_v0  ;;  %831 = vmatpush3.bf16.msra.mxu1 %v866_v37 }
 0x67d   :  { %832 = vmatprep.subr.bf16.mxu1 %v894_v0 }
 0x680   :  { %833 = vmatpush3.bf16.msra.mxu1 %v867_v38 }
 0x681   :  { %834 = vmatprep.subr.bf16.mxu1 %v894_v0 }
 0x684   :  { %835 = vmatpush3.bf16.msra.mxu1 %v868_v39 }
 0x685   :  { %836 = vmatprep.subr.bf16.mxu1 %v894_v0 }
 0x688   :  { %837 = vmatpush3.bf16.msra.mxu1 %v869_v40 }
 0x689   :  { %838 = vmatprep.subr.bf16.mxu1 %v894_v0 }
 0x68c   :  { %839 = vmatpush3.bf16.msra.mxu1 %v870_v41 }
 0x68d   :  { %840 = vmatprep.subr.bf16.mxu1 %v894_v0 }
 0x690   :  { %841 = vmatpush3.bf16.msra.mxu1 %v871_v42 }
 0x73b   :  { %v572_v43 = vpop.f32.mrf.mxu1 }
 0x73c   :  { %579 = vrot.lane.b32.xlu0 %v572_v43, %s897_s10  ;;  %s872_s10 = scalar_lea.vmem %s693_s17, 128 }
 0x73d   :  { %v828_v44 = vpop.f32.mrf.mxu1  ;;  %p873_p0 = scmp.ne.s32.totalorder %s693_s17, %s872_s10  ;;  %p878_p2 = scmp.lt.s32.totalorder %s872_s10, %s872_s10 }
 0x73f   :  { %v575_v45 = vpop.f32.mrf.mxu1  ;;  %p879_p3 = por %p878_p2, %p877_p1 }
 0x741   :  { %v829_v46 = vpop.f32.mrf.mxu1  ;;  %p880_p4 = pnand %p879_p3, %p873_p0 }
 0x7ae   :  { %v580_v47 = vpop.permute.xlu0 %579 }
 0x7af   :  { %583 = vst.msk [vmem:[#allocation3] sm:$0xff] %vm582_vm15, %v580_v47 }
 0x7b6   :  { %v584_v48 = vld [vmem:[#allocation3] sm:$0xff] }
 0x7b7   :  { %v585_v49 = vpack.c.bf16 %v584_v48, %v584_v48 }
 0x7b9   :  { %843 = vmatmul.mubr.msk.bf16.vlgmr.msra.gmra.mxu1 %vm638_vm0, %v585_v49 }
 0x879   :  { %v676_v52 = vpop.f32.mrf.mxu1 }
 0x87a   :  { %v677_v0 = vadd.f32 %v676_v52, %v601_v51 }
 0x87b   :  { %v844_v53 = vpop.f32.mrf.mxu1 }
 0x87c   :  { %v683_v54 = vmul.f32 0.1, %v677_v0  ;;  %vm682_vm1 = vcmp.ge.f32.partialorder %v677_v0, 0.0 }
 0x87d   :  { %v679_v55 = vpop.f32.mrf.mxu1 }
 0x87e   :  { %v684_v56 = vsel %vm682_vm1, %v677_v0, %v683_v54 }
 0x87f   :  { %v845_v57 = vpop.f32.mrf.mxu1  ;;  %685 = vst.msk [vmem:[#allocation4] sm:$0xff] %vm111_vm4, %v684_v56 }
 0x880   :  { %883 = shalt.err (!%p880_p4)
}
 0x881   :  { %695 = dma.vmem_to_hbm [thread:$0]  %s693_s17, 128, %s1107_s6, [#allocation5]  }
 0x882   :  { %892 = dma.done.wait [#allocation5], 128  }
 0x883   :  { %893 = vsyncadd [#allocation5], 4294967168 }
 0x884   :  { %699 = vsyncpa [#allocation5], 1 }

</bundles_post_ra>
